<compile_context>
chip_gen: v7x
topology: tpu7x:2x2x1
jax: 0.10.0
libtpu: 0.0.40
codegen_flags: <defaults>
</compile_context>

<pallas_src>
import functools

import jax
import jax.numpy as jnp
from jax.experimental import pallas as pl
from jax.experimental.pallas import tpu as pltpu

EPS = 1e-5

# MXU / intermediate dtype.  Flip to jnp.bfloat16 on v6e/v7x (~2x MXU rate, half the operand and
# intermediate bytes); accumulation and all BatchNorm math stay f32.  Kept f32 so the self-test
# asserts tightly against the pure-f32 reference (the matmuls are nowhere near the bottleneck at
# dim=4); loosen the tolerances if you flip it.
MXU_DTYPE = jnp.float32

# Scoped-VMEM request.  Per grid step the live set is ~2x(input block + output block) + weights +
# mask + the haloed image scratch: < 1 MiB at Bt=8, dim=4, 16x16.  32 MiB leaves headroom for much
# larger images while staying well under v7x's 64 MiB physical VMEM.
VMEM_LIMIT_BYTES = 32 * 1024 * 1024


def _round_up(x, m):
    return (x + m - 1) // m * m


def _pick_batch_tile(batch):
    """Images per grid step: amortize per-step overhead, keep >= 2 steps for v7x's two cores."""
    for bt in (8, 4, 2):
        if batch % bt == 0 and batch // bt >= 2:
            return bt
    return 1


def _conv_relu_stats_kernel(x_ref, w_ref, mask_ref, out_ref, stats_ref, xpi_ref, *, dim, wpad):
    """One grid step = Bt images.

    x_ref    : (Bt, C, P)   VMEM  zero-padded images, flattened (H+2)*(W+2) grid on the lane axis
                                  (P = that, rounded up to 128); rows 0..dim-1 real, rest zero.
    w_ref    : (9, C, C)    VMEM  tap-major folded weights; column `dim` is the fused
                                  time + BN-shift term applied to the interior-mask channel.
    mask_ref : (1, P)       VMEM  1.0 on interior (valid-pixel) lanes, 0.0 on halo / align pad.
    out_ref  : (Bt, C, P)   VMEM  relu(conv), halo lanes zeroed (directly consumable by block 2).
    stats_ref: (1, C, 2)    VMEM  per-step BatchNorm partials [sum, sum of squares].
    xpi_ref  : (Bt, C, P+2*margin) VMEM scratch: images with a zero halo so the 9 tap views are
                                  plain lane-shifted slices.
    """
    bt, c_blk, p_al = x_ref.shape
    margin = (xpi_ref.shape[-1] - p_al) // 2
    # Flattened-grid lane offset of each 3x3 tap (row stride of the padded grid = W+2).
    offs = [(kh - 1) * wpad + (kw - 1) for kh in range(3) for kw in range(3)]

    mask = mask_ref[...]                                               # (1, P) f32

    # Assemble the haloed images: zero only the margins (the interior zero-padding is already in
    # the data layout), then one lane-aligned bulk copy of the whole image tile.
    xpi_ref[:, :, :margin] = jnp.zeros((bt, c_blk, margin), xpi_ref.dtype)
    xpi_ref[:, :, margin + p_al:] = jnp.zeros((bt, c_blk, margin), xpi_ref.dtype)
    xpi_ref[:, :, margin:margin + p_al] = x_ref[...]

    s_acc = jnp.zeros((c_blk, 1), jnp.float32)
    s2_acc = jnp.zeros((c_blk, 1), jnp.float32)

    for b in range(bt):                                                # static unroll; independent
        # Fused "ones" channel (time + folded BN shift) lives at row `dim`.
        xpi_ref[b, dim:dim + 1, margin:margin + p_al] = mask.astype(xpi_ref.dtype)

        # 3x3 conv == 9 accumulating MXU matmuls on lane-shifted views of the padded image.
        acc = jnp.zeros((c_blk, p_al), jnp.float32)
        for tap in range(9):
            start = margin + offs[tap]
            window = xpi_ref[b, :, start:start + p_al]                 # (C, P) lane-shifted view
            acc = acc + jnp.dot(w_ref[tap], window,
                                preferred_element_type=jnp.float32)

        y = jnp.maximum(acc, 0.0) * mask                               # ReLU; zero halo columns
        out_ref[b] = y.astype(out_ref.dtype)

        # BatchNorm partials (halo columns are zero, so plain lane sums are exact).
        s_acc = s_acc + jnp.sum(y, axis=1, keepdims=True)
        s2_acc = s2_acc + jnp.sum(y * y, axis=1, keepdims=True)

    stats_ref[0, :, 0:1] = s_acc
    stats_ref[0, :, 1:2] = s2_acc


def _conv_block(xp, w_folded, mask, *, dim, wpad, n_pix, bt):
    """relu(conv3x3(...)) + BatchNorm partial stats; grid over batch tiles."""
    batch, c_blk, p_al = xp.shape
    grid = batch // bt
    margin = _round_up(wpad + 1, 128)        # >= largest flattened tap offset, lane aligned

    kernel = functools.partial(_conv_relu_stats_kernel, dim=dim, wpad=wpad)

    itemsize = jnp.dtype(MXU_DTYPE).itemsize
    flops = 2 * batch * n_pix * 9 * (dim + 1) * dim              # real channel counts
    bytes_accessed = (itemsize * (2 * batch * c_blk * p_al + w_folded.size)
                      + 4 * (mask.size + grid * c_blk * 2))

    return pl.pallas_call(
        kernel,
        grid=(grid,),
        in_specs=[
            pl.BlockSpec((bt, c_blk, p_al), lambda i: (i, 0, 0)),    # image tile
            pl.BlockSpec((9, c_blk, c_blk), lambda i: (0, 0, 0)),    # folded weights (resident)
            pl.BlockSpec((1, p_al), lambda i: (0, 0)),               # interior mask (resident)
        ],
        out_specs=[
            pl.BlockSpec((bt, c_blk, p_al), lambda i: (i, 0, 0)),    # relu(conv), lane dense
            pl.BlockSpec((1, c_blk, 2), lambda i: (i, 0, 0)),        # per-step BN partials
        ],
        out_shape=[
            jax.ShapeDtypeStruct((batch, c_blk, p_al), MXU_DTYPE),
            jax.ShapeDtypeStruct((grid, c_blk, 2), jnp.float32),
        ],
        scratch_shapes=[pltpu.VMEM((bt, c_blk, p_al + 2 * margin), MXU_DTYPE)],
        compiler_params=pltpu.CompilerParams(
            dimension_semantics=("parallel",),     # batch tiles independent -> megacore on v7x
            vmem_limit_bytes=VMEM_LIMIT_BYTES),
        cost_estimate=pl.CostEstimate(
            flops=flops, transcendentals=0, bytes_accessed=int(bytes_accessed)),
    )(xp, w_folded, mask)


def _fold_weights(w_oihw, t, scale, shift, c_blk):
    """(dim, dim+1, 3, 3) conv weights -> (9, c_blk, c_blk) tap-major folded weights.

    The previous block's BN is folded in: `scale` multiplies each real input channel's weights;
    `shift` plus the time channel collapse into a single column (index `dim`) that multiplies the
    kernel's interior-mask "ones" channel (so halo pixels correctly see zero).
    """
    dim = w_oihw.shape[0]
    w_sp = w_oihw[:, :dim]                                        # (o, i, kh, kw)
    w_t = w_oihw[:, dim]                                          # (o, kh, kw)  time-channel taps
    w_scaled = w_sp * scale.reshape(1, dim, 1, 1)
    w_ones = w_t * t + jnp.einsum("oikl,i->okl", w_sp, shift)
    wk = jnp.zeros((3, 3, c_blk, c_blk), jnp.float32)
    wk = wk.at[:, :, :dim, :dim].set(jnp.transpose(w_scaled, (2, 3, 0, 1)))
    wk = wk.at[:, :, :dim, dim].set(jnp.transpose(w_ones, (1, 2, 0)))
    return wk.reshape(9, c_blk, c_blk).astype(MXU_DTYPE)


def _to_padded_flat(x_nchw, c_blk, p_al):
    """NCHW -> (B, c_blk, P): zero-padded spatial grid flattened onto lanes, channel rows padded."""
    b, c, h, w = x_nchw.shape
    xp = jnp.pad(x_nchw.astype(jnp.float32), ((0, 0), (0, 0), (1, 1), (1, 1)))
    xp = xp.reshape(b, c, (h + 2) * (w + 2))
    xp = jnp.pad(xp, ((0, 0), (0, c_blk - c), (0, p_al - (h + 2) * (w + 2))))
    return xp.astype(MXU_DTYPE)


def _interior_mask(h, w, p_al):
    m = jnp.pad(jnp.ones((h, w), jnp.float32), ((1, 1), (1, 1)))
    m = m.reshape(1, (h + 2) * (w + 2))
    return jnp.pad(m, ((0, 0), (0, p_al - (h + 2) * (w + 2))))


def _bn_affine(stats, gamma, beta, n):
    """Fold training-mode BatchNorm (biased variance, eps) into a per-channel scale/shift."""
    dim = gamma.shape[0]
    s = jnp.sum(stats[:, :dim, 0], axis=0)
    s2 = jnp.sum(stats[:, :dim, 1], axis=0)
    mean = s / n
    # TODO(synk): one-pass E[x^2]-E[x]^2 can cancel for large-magnitude activations; switch to a
    #             shifted / Welford-style reduction if this runs on real feature maps.
    var = jnp.maximum(s2 / n - mean * mean, 0.0)
    scale = gamma * jax.lax.rsqrt(var + EPS)
    shift = beta - mean * scale
    return scale.astype(jnp.float32), shift.astype(jnp.float32)


def conv_odef_forward(x_nchw, t, params):
    """ConvODEF.forward(x, t).  x: NCHW (PyTorch convention), t: scalar."""
    batch, dim, h, w = x_nchw.shape
    n = batch * h * w
    wpad = w + 2
    p = (h + 2) * (w + 2)
    p_al = _round_up(p, 128)
    c_blk = _round_up(dim + 1, 8)            # dim real channels + the fused "ones" channel
    bt = _pick_batch_tile(batch)
    t_f = jnp.asarray(t, jnp.float32)

    mask = _interior_mask(h, w, p_al)
    xp = _to_padded_flat(x_nchw, c_blk, p_al)

    ones_d = jnp.ones((dim,), jnp.float32)
    zeros_d = jnp.zeros((dim,), jnp.float32)

    # Block 1: h_raw = relu(conv1(cat(x, t))), plus its BatchNorm partial statistics.
    w1k = _fold_weights(params["w1"], t_f, ones_d, zeros_d, c_blk)
    h_raw, stats1 = _conv_block(xp, w1k, mask, dim=dim, wpad=wpad, n_pix=h * w, bt=bt)
    scale1, shift1 = _bn_affine(stats1, params["g1"], params["b1"], n)

    # Block 2: BN1 is folded into conv2's weights (scale) and the "ones" column (shift + time),
    # so h_raw is consumed as-is -- no normalize / concatenate / re-pad passes in HBM.
    w2k = _fold_weights(params["w2"], t_f, scale1, shift1, c_blk)
    g_raw, stats2 = _conv_block(h_raw, w2k, mask, dim=dim, wpad=wpad, n_pix=h * w, bt=bt)
    scale2, shift2 = _bn_affine(stats2, params["g2"], params["b2"], n)

    # Final BN2 is a per-channel affine on the interior pixels; XLA fuses slice/reshape/affine.
    g = g_raw[:, :dim, :p].reshape(batch, dim, h + 2, w + 2)[:, :, 1:h + 1, 1:w + 1]
    return (g.astype(jnp.float32) * scale2.reshape(1, dim, 1, 1)
            + shift2.reshape(1, dim, 1, 1))


def init_params(key, dim):
    """Deterministic init mirroring nn.Conv2d (Kaiming-uniform-ish) + BN defaults."""
    k1, k2 = jax.random.split(key)
    cin = dim + 1
    bound = 1.0 / (cin * 3 * 3) ** 0.5
    w1 = jax.random.uniform(k1, (dim, cin, 3, 3), jnp.float32, -bound, bound)
    w2 = jax.random.uniform(k2, (dim, cin, 3, 3), jnp.float32, -bound, bound)
    return {
        "w1": w1, "g1": jnp.ones((dim,), jnp.float32), "b1": jnp.zeros((dim,), jnp.float32),
        "w2": w2, "g2": jnp.ones((dim,), jnp.float32), "b2": jnp.zeros((dim,), jnp.float32),
    }


def ref_forward(x_nchw, t, params):
    """Pure-JAX reference (NCHW) of the PyTorch forward, for verification."""
    def block(x, w, g, b):
        bsz, c, h, wd = x.shape
        tch = jnp.full((bsz, 1, h, wd), t, x.dtype)
        xt = jnp.concatenate([x, tch], axis=1)
        y = jax.lax.conv_general_dilated(
            xt, w, window_strides=(1, 1), padding="SAME",
            dimension_numbers=("NCHW", "OIHW", "NCHW"))
        y = jnp.maximum(y, 0.0)
        mean = y.mean(axis=(0, 2, 3), keepdims=True)
        var = ((y - mean) ** 2).mean(axis=(0, 2, 3), keepdims=True)
        return ((y - mean) * jax.lax.rsqrt(var + EPS) * g.reshape(1, -1, 1, 1)
                + b.reshape(1, -1, 1, 1))

    h = block(x_nchw, params["w1"], params["g1"], params["b1"])
    return block(h, params["w2"], params["g2"], params["b2"])


if __name__ == "__main__":
    key = jax.random.PRNGKey(0)
    kx, kp = jax.random.split(key)

    B, dim, H, W = 2, 4, 16, 16
    x = jax.random.normal(kx, (B, dim, H, W), jnp.float32)
    t = jnp.float32(0.5)
    params = init_params(kp, dim)

    fwd = jax.jit(conv_odef_forward)
    out = jax.block_until_ready(fwd(x, t, params))

    ref = ref_forward(x, t, params)
    assert out.shape == (B, dim, H, W)
    assert jnp.allclose(out, ref, atol=2e-3, rtol=2e-3), "mismatch vs JAX reference"

    print("KERNEL_OK")
</pallas_src>

<mosaic_0001>
module attributes {stable_mosaic.version = 11 : i64} {
  func.func @_conv_relu_stats_kernel(%arg0: i32, %arg1: memref<1x8x384xf32, #tpu.memory_space<vmem>>, %arg2: memref<9x8x8xf32, #tpu.memory_space<vmem>>, %arg3: memref<1x384xf32, #tpu.memory_space<vmem>>, %arg4: memref<1x8x384xf32, #tpu.memory_space<vmem>>, %arg5: memref<1x8x2xf32, #tpu.memory_space<vmem>>, %arg6: memref<1x8x640xf32, #tpu.memory_space<vmem>>) attributes {dimension_semantics = [#tpu.dimension_semantics<parallel>], iteration_bounds = array<i64: 2>, scalar_prefetch = 0 : i64, scratch_operands = 1 : i64, tpu.core_type = #tpu.core_type<tc>, window_params = [{transform_indices = @transform_0, window_bounds = array<i64: 1, 8, 384>}, {pipeline_mode = #tpu.pipeline_mode<synchronous>, transform_indices = @transform_1, window_bounds = array<i64: 9, 8, 8>}, {pipeline_mode = #tpu.pipeline_mode<synchronous>, transform_indices = @transform_2, window_bounds = array<i64: 1, 384>}, {transform_indices = @transform_3, window_bounds = array<i64: 1, 8, 384>}, {transform_indices = @transform_4, window_bounds = array<i64: 1, 8, 2>}]} {
    %c0 = arith.constant 0 : index
    %c0_0 = arith.constant 0 : index
    %0 = vector.load %arg3[%c0, %c0_0] : memref<1x384xf32, #tpu.memory_space<vmem>>, vector<1x384xf32>
    %cst = arith.constant 0.000000e+00 : f32
    %1 = vector.broadcast %cst : f32 to vector<1x8x128xf32>
    %c0_1 = arith.constant 0 : index
    %c0_2 = arith.constant 0 : index
    %c0_3 = arith.constant 0 : index
    %2 = vector.load %arg6[%c0_1, %c0_2, %c0_3] : memref<1x8x640xf32, #tpu.memory_space<vmem>>, vector<1x8x128xf32>
    tpu.vector_store %arg6[%c0_1, %c0_2, %c0_3], %1 {strides = array<i32>} : memref<1x8x640xf32, #tpu.memory_space<vmem>>, vector<1x8x128xf32>,
    %cst_4 = arith.constant 0.000000e+00 : f32
    %3 = vector.broadcast %cst_4 : f32 to vector<1x8x128xf32>
    %c0_5 = arith.constant 0 : index
    %c0_6 = arith.constant 0 : index
    %c512 = arith.constant 512 : index
    %4 = vector.load %arg6[%c0_5, %c0_6, %c512] : memref<1x8x640xf32, #tpu.memory_space<vmem>>, vector<1x8x128xf32>
    tpu.vector_store %arg6[%c0_5, %c0_6, %c512], %3 {strides = array<i32>} : memref<1x8x640xf32, #tpu.memory_space<vmem>>, vector<1x8x128xf32>,
    %c0_7 = arith.constant 0 : index
    %c0_8 = arith.constant 0 : index
    %c0_9 = arith.constant 0 : index
    %5 = vector.load %arg1[%c0_7, %c0_8, %c0_9] : memref<1x8x384xf32, #tpu.memory_space<vmem>>, vector<1x8x384xf32>
    %c0_10 = arith.constant 0 : index
    %c0_11 = arith.constant 0 : index
    %c128 = arith.constant 128 : index
    %6 = vector.load %arg6[%c0_10, %c0_11, %c128] : memref<1x8x640xf32, #tpu.memory_space<vmem>>, vector<1x8x384xf32>
    tpu.vector_store %arg6[%c0_10, %c0_11, %c128], %5 {strides = array<i32>} : memref<1x8x640xf32, #tpu.memory_space<vmem>>, vector<1x8x384xf32>,
    %cst_12 = arith.constant 0.000000e+00 : f32
    %7 = vector.broadcast %cst_12 : f32 to vector<8x1xf32>
    %cst_13 = arith.constant 0.000000e+00 : f32
    %8 = vector.broadcast %cst_13 : f32 to vector<8x1xf32>
    %c0_14 = arith.constant 0 : index
    %c4 = arith.constant 4 : index
    %c128_15 = arith.constant 128 : index
    %9 = vector.load %arg6[%c0_14, %c4, %c128_15] : memref<1x8x640xf32, #tpu.memory_space<vmem>>, vector<1x1x384xf32>
    %10 = vector.shape_cast %9 : vector<1x1x384xf32> to vector<1x384xf32>
    %11 = vector.shape_cast %0 : vector<1x384xf32> to vector<1x1x384xf32>
    tpu.vector_store %arg6[%c0_14, %c4, %c128_15], %11 {strides = array<i32>} : memref<1x8x640xf32, #tpu.memory_space<vmem>>, vector<1x1x384xf32>,
    %cst_16 = arith.constant 0.000000e+00 : f32
    %12 = vector.broadcast %cst_16 : f32 to vector<8x384xf32>
    %c0_17 = arith.constant 0 : index
    %c0_18 = arith.constant 0 : index
    %c109 = arith.constant 109 : index
    %13 = vector.load %arg6[%c0_17, %c0_18, %c109] : memref<1x8x640xf32, #tpu.memory_space<vmem>>, vector<1x8x384xf32>
    %14 = vector.shape_cast %13 : vector<1x8x384xf32> to vector<8x384xf32>
    %c0_19 = arith.constant 0 : index
    %c0_20 = arith.constant 0 : index
    %c0_21 = arith.constant 0 : index
    %15 = vector.load %arg2[%c0_19, %c0_20, %c0_21] : memref<9x8x8xf32, #tpu.memory_space<vmem>>, vector<1x8x8xf32>
    %16 = vector.shape_cast %15 : vector<1x8x8xf32> to vector<8x8xf32>
    %cst_22 = arith.constant dense<0.000000e+00> : vector<8x384xf32>
    %17 = tpu.matmul %16, %14, %cst_22 {dimension_numbers = #tpu.dot_dimension_numbers<[1], [0], [0], [1], [0, 0, 1, 1], [], []>} : vector<8x8xf32>, vector<8x384xf32>, vector<8x384xf32> -> vector<8x384xf32>
    %18 = arith.addf %12, %17 : vector<8x384xf32>
    %c0_23 = arith.constant 0 : index
    %c0_24 = arith.constant 0 : index
    %c110 = arith.constant 110 : index
    %19 = vector.load %arg6[%c0_23, %c0_24, %c110] : memref<1x8x640xf32, #tpu.memory_space<vmem>>, vector<1x8x384xf32>
    %20 = vector.shape_cast %19 : vector<1x8x384xf32> to vector<8x384xf32>
    %c1 = arith.constant 1 : index
    %c0_25 = arith.constant 0 : index
    %c0_26 = arith.constant 0 : index
    %21 = vector.load %arg2[%c1, %c0_25, %c0_26] : memref<9x8x8xf32, #tpu.memory_space<vmem>>, vector<1x8x8xf32>
    %22 = vector.shape_cast %21 : vector<1x8x8xf32> to vector<8x8xf32>
    %cst_27 = arith.constant dense<0.000000e+00> : vector<8x384xf32>
    %23 = tpu.matmul %22, %20, %cst_27 {dimension_numbers = #tpu.dot_dimension_numbers<[1], [0], [0], [1], [0, 0, 1, 1], [], []>} : vector<8x8xf32>, vector<8x384xf32>, vector<8x384xf32> -> vector<8x384xf32>
    %24 = arith.addf %18, %23 : vector<8x384xf32>
    %c0_28 = arith.constant 0 : index
    %c0_29 = arith.constant 0 : index
    %c111 = arith.constant 111 : index
    %25 = vector.load %arg6[%c0_28, %c0_29, %c111] : memref<1x8x640xf32, #tpu.memory_space<vmem>>, vector<1x8x384xf32>
    %26 = vector.shape_cast %25 : vector<1x8x384xf32> to vector<8x384xf32>
    %c2 = arith.constant 2 : index
    %c0_30 = arith.constant 0 : index
    %c0_31 = arith.constant 0 : index
    %27 = vector.load %arg2[%c2, %c0_30, %c0_31] : memref<9x8x8xf32, #tpu.memory_space<vmem>>, vector<1x8x8xf32>
    %28 = vector.shape_cast %27 : vector<1x8x8xf32> to vector<8x8xf32>
    %cst_32 = arith.constant dense<0.000000e+00> : vector<8x384xf32>
    %29 = tpu.matmul %28, %26, %cst_32 {dimension_numbers = #tpu.dot_dimension_numbers<[1], [0], [0], [1], [0, 0, 1, 1], [], []>} : vector<8x8xf32>, vector<8x384xf32>, vector<8x384xf32> -> vector<8x384xf32>
    %30 = arith.addf %24, %29 : vector<8x384xf32>
    %c0_33 = arith.constant 0 : index
    %c0_34 = arith.constant 0 : index
    %c127 = arith.constant 127 : index
    %31 = vector.load %arg6[%c0_33, %c0_34, %c127] : memref<1x8x640xf32, #tpu.memory_space<vmem>>, vector<1x8x384xf32>
    %32 = vector.shape_cast %31 : vector<1x8x384xf32> to vector<8x384xf32>
    %c3 = arith.constant 3 : index
    %c0_35 = arith.constant 0 : index
    %c0_36 = arith.constant 0 : index
    %33 = vector.load %arg2[%c3, %c0_35, %c0_36] : memref<9x8x8xf32, #tpu.memory_space<vmem>>, vector<1x8x8xf32>
    %34 = vector.shape_cast %33 : vector<1x8x8xf32> to vector<8x8xf32>
    %cst_37 = arith.constant dense<0.000000e+00> : vector<8x384xf32>
    %35 = tpu.matmul %34, %32, %cst_37 {dimension_numbers = #tpu.dot_dimension_numbers<[1], [0], [0], [1], [0, 0, 1, 1], [], []>} : vector<8x8xf32>, vector<8x384xf32>, vector<8x384xf32> -> vector<8x384xf32>
    %36 = arith.addf %30, %35 : vector<8x384xf32>
    %c0_38 = arith.constant 0 : index
    %c0_39 = arith.constant 0 : index
    %c128_40 = arith.constant 128 : index
    %37 = vector.load %arg6[%c0_38, %c0_39, %c128_40] : memref<1x8x640xf32, #tpu.memory_space<vmem>>, vector<1x8x384xf32>
    %38 = vector.shape_cast %37 : vector<1x8x384xf32> to vector<8x384xf32>
    %c4_41 = arith.constant 4 : index
    %c0_42 = arith.constant 0 : index
    %c0_43 = arith.constant 0 : index
    %39 = vector.load %arg2[%c4_41, %c0_42, %c0_43] : memref<9x8x8xf32, #tpu.memory_space<vmem>>, vector<1x8x8xf32>
    %40 = vector.shape_cast %39 : vector<1x8x8xf32> to vector<8x8xf32>
    %cst_44 = arith.constant dense<0.000000e+00> : vector<8x384xf32>
    %41 = tpu.matmul %40, %38, %cst_44 {dimension_numbers = #tpu.dot_dimension_numbers<[1], [0], [0], [1], [0, 0, 1, 1], [], []>} : vector<8x8xf32>, vector<8x384xf32>, vector<8x384xf32> -> vector<8x384xf32>
    %42 = arith.addf %36, %41 : vector<8x384xf32>
    %c0_45 = arith.constant 0 : index
    %c0_46 = arith.constant 0 : index
    %c129 = arith.constant 129 : index
    %43 = vector.load %arg6[%c0_45, %c0_46, %c129] : memref<1x8x640xf32, #tpu.memory_space<vmem>>, vector<1x8x384xf32>
    %44 = vector.shape_cast %43 : vector<1x8x384xf32> to vector<8x384xf32>
    %c5 = arith.constant 5 : index
    %c0_47 = arith.constant 0 : index
    %c0_48 = arith.constant 0 : index
    %45 = vector.load %arg2[%c5, %c0_47, %c0_48] : memref<9x8x8xf32, #tpu.memory_space<vmem>>, vector<1x8x8xf32>
    %46 = vector.shape_cast %45 : vector<1x8x8xf32> to vector<8x8xf32>
    %cst_49 = arith.constant dense<0.000000e+00> : vector<8x384xf32>
    %47 = tpu.matmul %46, %44, %cst_49 {dimension_numbers = #tpu.dot_dimension_numbers<[1], [0], [0], [1], [0, 0, 1, 1], [], []>} : vector<8x8xf32>, vector<8x384xf32>, vector<8x384xf32> -> vector<8x384xf32>
    %48 = arith.addf %42, %47 : vector<8x384xf32>
    %c0_50 = arith.constant 0 : index
    %c0_51 = arith.constant 0 : index
    %c145 = arith.constant 145 : index
    %49 = vector.load %arg6[%c0_50, %c0_51, %c145] : memref<1x8x640xf32, #tpu.memory_space<vmem>>, vector<1x8x384xf32>
    %50 = vector.shape_cast %49 : vector<1x8x384xf32> to vector<8x384xf32>
    %c6 = arith.constant 6 : index
    %c0_52 = arith.constant 0 : index
    %c0_53 = arith.constant 0 : index
    %51 = vector.load %arg2[%c6, %c0_52, %c0_53] : memref<9x8x8xf32, #tpu.memory_space<vmem>>, vector<1x8x8xf32>
    %52 = vector.shape_cast %51 : vector<1x8x8xf32> to vector<8x8xf32>
    %cst_54 = arith.constant dense<0.000000e+00> : vector<8x384xf32>
    %53 = tpu.matmul %52, %50, %cst_54 {dimension_numbers = #tpu.dot_dimension_numbers<[1], [0], [0], [1], [0, 0, 1, 1], [], []>} : vector<8x8xf32>, vector<8x384xf32>, vector<8x384xf32> -> vector<8x384xf32>
    %54 = arith.addf %48, %53 : vector<8x384xf32>
    %c0_55 = arith.constant 0 : index
    %c0_56 = arith.constant 0 : index
    %c146 = arith.constant 146 : index
    %55 = vector.load %arg6[%c0_55, %c0_56, %c146] : memref<1x8x640xf32, #tpu.memory_space<vmem>>, vector<1x8x384xf32>
    %56 = vector.shape_cast %55 : vector<1x8x384xf32> to vector<8x384xf32>
    %c7 = arith.constant 7 : index
    %c0_57 = arith.constant 0 : index
    %c0_58 = arith.constant 0 : index
    %57 = vector.load %arg2[%c7, %c0_57, %c0_58] : memref<9x8x8xf32, #tpu.memory_space<vmem>>, vector<1x8x8xf32>
    %58 = vector.shape_cast %57 : vector<1x8x8xf32> to vector<8x8xf32>
    %cst_59 = arith.constant dense<0.000000e+00> : vector<8x384xf32>
    %59 = tpu.matmul %58, %56, %cst_59 {dimension_numbers = #tpu.dot_dimension_numbers<[1], [0], [0], [1], [0, 0, 1, 1], [], []>} : vector<8x8xf32>, vector<8x384xf32>, vector<8x384xf32> -> vector<8x384xf32>
    %60 = arith.addf %54, %59 : vector<8x384xf32>
    %c0_60 = arith.constant 0 : index
    %c0_61 = arith.constant 0 : index
    %c147 = arith.constant 147 : index
    %61 = vector.load %arg6[%c0_60, %c0_61, %c147] : memref<1x8x640xf32, #tpu.memory_space<vmem>>, vector<1x8x384xf32>
    %62 = vector.shape_cast %61 : vector<1x8x384xf32> to vector<8x384xf32>
    %c8 = arith.constant 8 : index
    %c0_62 = arith.constant 0 : index
    %c0_63 = arith.constant 0 : index
    %63 = vector.load %arg2[%c8, %c0_62, %c0_63] : memref<9x8x8xf32, #tpu.memory_space<vmem>>, vector<1x8x8xf32>
    %64 = vector.shape_cast %63 : vector<1x8x8xf32> to vector<8x8xf32>
    %cst_64 = arith.constant dense<0.000000e+00> : vector<8x384xf32>
    %65 = tpu.matmul %64, %62, %cst_64 {dimension_numbers = #tpu.dot_dimension_numbers<[1], [0], [0], [1], [0, 0, 1, 1], [], []>} : vector<8x8xf32>, vector<8x384xf32>, vector<8x384xf32> -> vector<8x384xf32>
    %66 = arith.addf %60, %65 : vector<8x384xf32>
    %cst_65 = arith.constant 0.000000e+00 : f32
    %67 = vector.broadcast %cst_65 : f32 to vector<8x384xf32>
    %68 = arith.maximumf %66, %67 : vector<8x384xf32>
    %69 = vector.broadcast %0 : vector<1x384xf32> to vector<8x384xf32>
    %70 = arith.mulf %68, %69 : vector<8x384xf32>
    %c0_66 = arith.constant 0 : index
    %c0_67 = arith.constant 0 : index
    %c0_68 = arith.constant 0 : index
    %71 = vector.load %arg4[%c0_66, %c0_67, %c0_68] : memref<1x8x384xf32, #tpu.memory_space<vmem>>, vector<1x8x384xf32>
    %72 = vector.shape_cast %71 : vector<1x8x384xf32> to vector<8x384xf32>
    %73 = vector.shape_cast %70 : vector<8x384xf32> to vector<1x8x384xf32>
    tpu.vector_store %arg4[%c0_66, %c0_67, %c0_68], %73 {strides = array<i32>} : memref<1x8x384xf32, #tpu.memory_space<vmem>>, vector<1x8x384xf32>,
    %cst_69 = arith.constant dense<0.000000e+00> : vector<8xf32>
    %74 = vector.multi_reduction <add>, %70, %cst_69 [1] : vector<8x384xf32> to vector<8xf32>
    %75 = vector.shape_cast %74 : vector<8xf32> to vector<8x1xf32>
    %76 = arith.addf %7, %75 : vector<8x1xf32>
    %77 = arith.mulf %70, %70 : vector<8x384xf32>
    %cst_70 = arith.constant dense<0.000000e+00> : vector<8xf32>
    %78 = vector.multi_reduction <add>, %77, %cst_70 [1] : vector<8x384xf32> to vector<8xf32>
    %79 = vector.shape_cast %78 : vector<8xf32> to vector<8x1xf32>
    %80 = arith.addf %8, %79 : vector<8x1xf32>
    %c0_71 = arith.constant 0 : index
    %c0_72 = arith.constant 0 : index
    %c0_73 = arith.constant 0 : index
    %81 = vector.load %arg5[%c0_71, %c0_72, %c0_73] : memref<1x8x2xf32, #tpu.memory_space<vmem>>, vector<1x8x1xf32>
    %82 = vector.shape_cast %81 : vector<1x8x1xf32> to vector<8x1xf32>
    %83 = vector.shape_cast %76 : vector<8x1xf32> to vector<1x8x1xf32>
    tpu.vector_store %arg5[%c0_71, %c0_72, %c0_73], %83 {strides = array<i32>} : memref<1x8x2xf32, #tpu.memory_space<vmem>>, vector<1x8x1xf32>,
    %c0_74 = arith.constant 0 : index
    %c0_75 = arith.constant 0 : index
    %c1_76 = arith.constant 1 : index
    %84 = vector.load %arg5[%c0_74, %c0_75, %c1_76] : memref<1x8x2xf32, #tpu.memory_space<vmem>>, vector<1x8x1xf32>
    %85 = vector.shape_cast %84 : vector<1x8x1xf32> to vector<8x1xf32>
    %86 = vector.shape_cast %80 : vector<8x1xf32> to vector<1x8x1xf32>
    tpu.vector_store %arg5[%c0_74, %c0_75, %c1_76], %86 {strides = array<i32>} : memref<1x8x2xf32, #tpu.memory_space<vmem>>, vector<1x8x1xf32>,
    return
  }
  func.func @transform_0(%arg0: i32) -> (i32, i32, i32) {
    %c0_i32 = arith.constant 0 : i32
    %c0_i32_0 = arith.constant 0 : i32
    %c0_i32_1 = arith.constant 0 : i32
    return %arg0, %c0_i32, %c0_i32_0 : i32, i32, i32
  }
  func.func @transform_1(%arg0: i32) -> (i32, i32, i32) {
    %c0_i32 = arith.constant 0 : i32
    %c0_i32_0 = arith.constant 0 : i32
    %c0_i32_1 = arith.constant 0 : i32
    %c0_i32_2 = arith.constant 0 : i32
    return %c0_i32, %c0_i32_0, %c0_i32_1 : i32, i32, i32
  }
  func.func @transform_2(%arg0: i32) -> (i32, i32) {
    %c0_i32 = arith.constant 0 : i32
    %c0_i32_0 = arith.constant 0 : i32
    %c0_i32_1 = arith.constant 0 : i32
    return %c0_i32, %c0_i32_0 : i32, i32
  }
  func.func @transform_3(%arg0: i32) -> (i32, i32, i32) {
    %c0_i32 = arith.constant 0 : i32
    %c0_i32_0 = arith.constant 0 : i32
    %c0_i32_1 = arith.constant 0 : i32
    return %arg0, %c0_i32, %c0_i32_0 : i32, i32, i32
  }
  func.func @transform_4(%arg0: i32) -> (i32, i32, i32) {
    %c0_i32 = arith.constant 0 : i32
    %c0_i32_0 = arith.constant 0 : i32
    %c0_i32_1 = arith.constant 0 : i32
    return %arg0, %c0_i32, %c0_i32_0 : i32, i32, i32
  }
}

</mosaic_0001>

<bundles_post_ra>
// kernel: conv_odef_forward.2
= control target key start
LH: loop header
LB: loop body
LE: loop exit
PB: predicated region body
PF: predicated region fallthrough
CT: control target
= control target key end

     0   :  { %s2016_s15 = smov 0   ;;  %s2193_s0 = inlined_call_operand.vmem [shape: f32[2,8,384], index: 0, kind: input, shape index: {}]   ;;  %s2194_s1 = inlined_call_operand.vmem [shape: f32[9,8,8], index: 1, kind: input, shape index: {}]   ;;  %s2195_s2 = inlined_call_operand.vmem [shape: f32[1,384], index: 2, kind: input, shape index: {}]   ;;  %s2196_s3 = inlined_call_operand.vmem [shape: f32[2,8,384], index: 3, kind: output, shape index: {0}]   ;;  %s2197_s4 = inlined_call_operand.vmem [shape: f32[2,8,2], index: 4, kind: output, shape index: {1}]  }
   0x1 LB: > { %s1823_s16 = sadd.s32 4294967295, %s1979_s15   ;;  %p1827_p0 = scmp.ge.s32.totalorder %s1979_s15, 1  ;;  %s1979_s15 = sphi %s2016_s15, %s15_s15  }
   0x2   : > { %p165_p1 = scmp.lt.s32.totalorder %s1979_s15, 3 }
   0x4   : > { %p166_p2 = pnand %p1827_p0, %p165_p1 }
   0x5   : > { %p195_p3 = scmp.lt.s32.totalorder (!%p166_p2), %s1823_s16, 1  ;;  %v1981_v0 = vmov (!%p166_p2), 0.0   ;;  %s1982_s17 = smov (!%p166_p2), 18   ;;  %v218_v1 = vlaneseq (!%p166_p2)  ;;  %v2038_v2 = vld [vmem:[%s2195_s2] sm:$0x7] (!%p166_p2)  ;;  %vm1983_vm1 = vmmov (!%p166_p2), 0  }
   0x6   : > { %169 = sbr.rel (%p166_p2) target bundleno = 580 (0x244), region = 32  ;;  %236 = vrot.lane.b32.xlu1 (!%p166_p2), %v1981_v0, %s1982_s17  ;;  %1877 = vmatprep.subr.mxu1 (!%p166_p2), %v1981_v0  ;;  %s1984_s24 = smov (!%p166_p2), 19   ;;  %vm244_vm2 = vcmask (!%p166_p2), 146432   ;;  %v1831_v14 = vld [vmem:[%s2194_s1 + $0x8] sm:$0xff] (!%p166_p2)  ;;  %vm251_vm3 = vcmask (!%p166_p2), 64512   ;;  %vm404_vm4 = vcmask (!%p166_p2), 154624  }
   0x7   : > { %319 = vmatprep.mubr.f32.mxu0 (!%p166_p2), %v1981_v0  ;;  %vm220_vm0 = vcmp.lt.s32.totalorder (!%p166_p2), %v218_v1, 384  ;;  %1879 = vmatprep.mubr.msk.f32.mxu1 (!%p166_p2), %vm1983_vm1, %v1981_v0  ;;  %s1985_s25 = smov (!%p166_p2), 17   ;;  %s1986_s26 = smov (!%p166_p2), 1   ;;  %v229_v24 = vld [vmem:[%s2194_s1] sm:$0xff] (!%p166_p2)  ;;  %vm565_vm5 = vcmask (!%p166_p2), 138240   ;;  %v1836_v32 = vld [vmem:[%s2194_s1 + $0x10] sm:$0xff] (!%p166_p2) }
   0x8   : > { %s1987_s27 = smov (!%p166_p2), 127   ;;  %s1988_s28 = smov (!%p166_p2), 111   ;;  %vm729_vm6 = vcmask (!%p166_p2), 7168   ;;  %v1839_v39 = vld [vmem:[%s2194_s1 + $0x18] sm:$0xff] (!%p166_p2)  ;;  %vm1050_vm7 = vcmask (!%p166_p2), 1039360   ;;  %v1842_v45 = vld [vmem:[%s2194_s1 + $0x20] sm:$0xff] (!%p166_p2) }
   0x9   : > { %s1989_s29 = smov (!%p166_p2), 110   ;;  %s1990_s30 = smov (!%p166_p2), 109   ;;  %vm1214_vm8 = vcmask (!%p166_p2), 908288   ;;  %v1845_v53 = vld [vmem:[%s2194_s1 + $0x28] sm:$0xff] (!%p166_p2)  ;;  %vm1378_vm9 = vcmask (!%p166_p2), 900096   ;;  %v1848_v61 = vld [vmem:[%s2194_s1 + $0x30] sm:$0xff] (!%p166_p2) }
   0xa   : > { %vm1542_vm10 = vcmask (!%p166_p2), 891904   ;;  %vm1735_vm11 = vcmask (!%p166_p2), 15368  }
   0xd   : > { %s2199_s16 = smov (!%p195_p3, %s1823_s16), 1 }
   0xe   : > { %s1954_s18 = smul.u32 24, %s2199_s16 }
  0x10   : > { %s199_s21 = scalar_lea.vmem %s2193_s0, %s1954_s18 }
  0x11   : > { %v212_v3 = vld [vmem:[%s199_s21] sm:$0xff]  ;;  %v213_v4 = vld [vmem:[%s199_s21 + $0x8] sm:$0xff]  ;;  %v214_v5 = vld [vmem:[%s199_s21 + $0x10] sm:$0xff] }
  0x12   : > { %215 = vst [vmem:[#allocation2 + $0x8] sm:$0xff] %v212_v3  ;;  %216 = vst [vmem:[#allocation2 + $0x10] sm:$0xff] %v213_v4 }
  0x13   : > { %217 = vst [vmem:[#allocation2 + $0x18] sm:$0xff] %v214_v5 }
  0x14   : > { %223 = vst.msk [vmem:[#allocation2 + $0xc] ss:$8 sm:$0x7] %vm220_vm0, %v2038_v2 }
  0x1b   : > { %v2044_v6 = vld [vmem:[#allocation2 + $0x8] sm:$0xff]  ;;  %v2046_v7 = vld [vmem:[#allocation2 + $0x18] sm:$0xff]  ;;  %v2050_v8 = vld [vmem:[#allocation2 + $0x10] sm:$0xff] }
  0x1c   : > { %238 = vrot.lane.b32.xlu0 %v2044_v6, %s1982_s17  ;;  %242 = vrot.lane.b32.xlu1 %v2046_v7, %s1982_s17 }
  0x20   : > { %240 = vrot.lane.b32.xlu0 %v2050_v8, %s1982_s17  ;;  %400 = vrot.lane.b32.xlu1 %v2050_v8, %s1984_s24 }
  0x24   : > { %398 = vrot.lane.b32.xlu0 %v2044_v6, %s1984_s24  ;;  %402 = vrot.lane.b32.xlu1 %v2046_v7, %s1984_s24 }
  0x28   : > { %396 = vrot.lane.b32.xlu0 %v1981_v0, %s1984_s24  ;;  %561 = vrot.lane.b32.xlu1 %v2050_v8, %s1985_s25 }
  0x2c   : > { %559 = vrot.lane.b32.xlu0 %v2044_v6, %s1985_s25  ;;  %563 = vrot.lane.b32.xlu1 %v2046_v7, %s1985_s25 }
  0x30   : > { %557 = vrot.lane.b32.xlu0 %v1981_v0, %s1985_s25  ;;  %725 = vrot.lane.b32.xlu1 %v2050_v8, %s1986_s26 }
  0x34   : > { %723 = vrot.lane.b32.xlu0 %v2044_v6, %s1986_s26  ;;  %727 = vrot.lane.b32.xlu1 %v2046_v7, %s1986_s26 }
  0x38   : > { %721 = vrot.lane.b32.xlu0 %v1981_v0, %s1986_s26  ;;  %1046 = vrot.lane.b32.xlu1 %v2046_v7, %s1987_s27 }
  0x3c   : > { %1044 = vrot.lane.b32.xlu0 %v2050_v8, %s1987_s27  ;;  %1048 = vrot.lane.b32.xlu1 %v1981_v0, %s1987_s27 }
  0x40   : > { %1042 = vrot.lane.b32.xlu0 %v2044_v6, %s1987_s27  ;;  %1210 = vrot.lane.b32.xlu1 %v2046_v7, %s1988_s28 }
  0x44   : > { %1208 = vrot.lane.b32.xlu0 %v2050_v8, %s1988_s28  ;;  %1212 = vrot.lane.b32.xlu1 %v1981_v0, %s1988_s28 }
  0x48   : > { %1206 = vrot.lane.b32.xlu0 %v2044_v6, %s1988_s28  ;;  %1374 = vrot.lane.b32.xlu1 %v2046_v7, %s1989_s29  ;;  %s204_s28 = scalar_lea.vmem %s2196_s3, %s1954_s18  ;;  %s1830_s18 = sshll.u32 %s2199_s16, 3 }
  0x49   : > { %s208_s5 = scalar_lea.vmem %s2197_s4, %s1830_s18 }
  0x4c   : > { %1372 = vrot.lane.b32.xlu0 %v2050_v8, %s1989_s29  ;;  %1376 = vrot.lane.b32.xlu1 %v1981_v0, %s1989_s29 }
  0x50   : > { %1370 = vrot.lane.b32.xlu0 %v2044_v6, %s1989_s29  ;;  %1538 = vrot.lane.b32.xlu1 %v2046_v7, %s1990_s30 }
  0x54   : > { %1536 = vrot.lane.b32.xlu0 %v2050_v8, %s1990_s30  ;;  %1540 = vrot.lane.b32.xlu1 %v1981_v0, %s1990_s30 }
  0x58   : > { %1534 = vrot.lane.b32.xlu0 %v2044_v6, %s1990_s30 }
  0x78   : > { %v237_v9 = vpop.permute.xlu1 %236 }
  0x8e   : > { %v239_v10 = vpop.permute.xlu0 %238  ;;  %v243_v11 = vpop.permute.xlu1 %242 }
  0x8f   : > { %v245_v17 = vsel %vm244_vm2, %v237_v9, %v239_v10 }
  0x92   : > { %v241_v12 = vpop.permute.xlu0 %240  ;;  %v401_v13 = vpop.permute.xlu1 %400 }
  0x93   : > { %v246_v15 = vsel %vm244_vm2, %v239_v10, %v241_v12  ;;  %v247_v16 = vsel %vm244_vm2, %v241_v12, %v243_v11  ;;  %v1854_v12 = vld [vmem:[%s2194_s1 + $0x40] sm:$0xff] }
  0x94   : > { %255 = vmatprep.subr.mxu0 %v246_v15  ;;  %1878 = vmatpush3.msra.mxu1 %v247_v16 }
  0x95   : > { %256 = vmatpush1.msra.mxu0 %v245_v17  ;;  %1880 = vmatmul.mubr.msk.f32.vlgmr.msra.gmra.mrb[0].mxu1 %vm251_vm3, %v1831_v14 }
  0x96   : > { %1832 = vmatmul.mubr.msk.f32.vlgmr.msra.gmra.mrb[0].mxu0 %vm251_vm3, %v1831_v14  ;;  %v399_v18 = vpop.permute.xlu0 %398  ;;  %v403_v19 = vpop.permute.xlu1 %402  ;;  %1882 = vmatprep.subr.mxu1 %v1981_v0 }
  0x97   : > { %v406_v20 = vsel %vm404_vm4, %v399_v18, %v401_v13  ;;  %v407_v21 = vsel %vm404_vm4, %v401_v13, %v403_v19  ;;  %1884 = vmatprep.mubr.msk.f32.mxu1 %vm1983_vm1, %v1981_v0  ;;  %478 = vmatprep.mubr.f32.mxu0 %v1981_v0  ;;  %v1701_v13 = vshrl.u32 %v218_v1, 7 }
  0x98   : > { %414 = vmatprep.subr.mxu0 %v406_v20  ;;  %1883 = vmatpush3.msra.mxu1 %v407_v21 }
  0x99   : > { %1887 = vmatprep.subr.mxu1 %v1981_v0  ;;  %v1710_v14 = vsub.s32 2, %v1701_v13  ;;  %v1702_v15 = vsub.s32 0, %v1701_v13  ;;  %v1706_v16 = vsub.s32 1, %v1701_v13 }
  0x9a   : > { %v397_v22 = vpop.permute.xlu0 %396  ;;  %v562_v23 = vpop.permute.xlu1 %561 }
  0x9b   : > { %v405_v25 = vsel %vm404_vm4, %v397_v22, %v399_v18  ;;  %v1711_v17 = vrot.slane %v2038_v2, %v1710_v14  ;;  %v1703_v19 = vrot.slane %v2038_v2, %v1702_v15  ;;  %v1707_v22 = vrot.slane %v2038_v2, %v1706_v16 }
  0x9c   : > { %415 = vmatpush1.msra.mxu0 %v405_v25 }
  0x9d   : > { %1885 = vmatmul.mubr.msk.f32.vlgmr.msra.gmra.mrb[0].mxu1 %vm251_vm3, %v229_v24 }
  0x9e   : > { %1834 = vmatmul.mubr.msk.f32.vlgmr.msra.gmra.mrb[0].mxu0 %vm251_vm3, %v229_v24  ;;  %v560_v26 = vpop.permute.xlu0 %559  ;;  %v564_v27 = vpop.permute.xlu1 %563  ;;  %1889 = vmatprep.mubr.msk.f32.mxu1 %vm1983_vm1, %v1981_v0 }
  0x9f   : > { %v567_v28 = vsel %vm565_vm5, %v560_v26, %v562_v23  ;;  %v568_v29 = vsel %vm565_vm5, %v562_v23, %v564_v27  ;;  %639 = vmatprep.mubr.f32.mxu0 %v1981_v0 }
  0xa0   : > { %575 = vmatprep.subr.mxu0 %v567_v28  ;;  %1888 = vmatpush3.msra.mxu1 %v568_v29 }
  0xa1   : > { %1892 = vmatprep.subr.mxu1 %v1981_v0 }
  0xa2   : > { %v558_v30 = vpop.permute.xlu0 %557  ;;  %v726_v31 = vpop.permute.xlu1 %725 }
  0xa3   : > { %v566_v33 = vsel %vm565_vm5, %v558_v30, %v560_v26 }
  0xa4   : > { %576 = vmatpush1.msra.mxu0 %v566_v33 }
  0xa5   : > { %1890 = vmatmul.mubr.msk.f32.vlgmr.msra.gmra.mrb[0].mxu1 %vm251_vm3, %v1836_v32 }
  0xa6   : > { %1837 = vmatmul.mubr.msk.f32.vlgmr.msra.gmra.mrb[0].mxu0 %vm251_vm3, %v1836_v32  ;;  %v724_v34 = vpop.permute.xlu0 %723  ;;  %v728_v35 = vpop.permute.xlu1 %727  ;;  %1894 = vmatprep.mubr.msk.f32.mxu1 %vm1983_vm1, %v1981_v0 }
  0xa7   : > { %v731_v36 = vsel %vm729_vm6, %v724_v34, %v726_v31  ;;  %v732_v37 = vsel %vm729_vm6, %v726_v31, %v728_v35  ;;  %803 = vmatprep.mubr.f32.mxu0 %v1981_v0 }
  0xa8   : > { %739 = vmatprep.subr.mxu0 %v731_v36  ;;  %1893 = vmatpush3.msra.mxu1 %v732_v37 }
  0xa9   : > { %1897 = vmatprep.subr.mxu1 %v1981_v0 }
  0xaa   : > { %v722_v38 = vpop.permute.xlu0 %721  ;;  %v1047_v40 = vpop.permute.xlu1 %1046 }
  0xab   : > { %v730_v41 = vsel %vm729_vm6, %v722_v38, %v724_v34 }
  0xac   : > { %740 = vmatpush1.msra.mxu0 %v730_v41 }
  0xad   : > { %1895 = vmatmul.mubr.msk.f32.vlgmr.msra.gmra.mrb[0].mxu1 %vm251_vm3, %v1839_v39  ;;  %888 = vmatprep.subr.mxu0 %v2050_v8  ;;  %v1851_v8 = vld [vmem:[%s2194_s1 + $0x38] sm:$0xff] }
  0xae   : > { %1840 = vmatmul.mubr.msk.f32.vlgmr.msra.gmra.mrb[0].mxu0 %vm251_vm3, %v1839_v39  ;;  %v1045_v42 = vpop.permute.xlu0 %1044  ;;  %1898 = vmatpush3.msra.mxu1 %v2046_v7  ;;  %v1049_v43 = vpop.permute.xlu1 %1048 }
  0xaf   : > { %889 = vmatpush1.msra.mxu0 %v2044_v6  ;;  %1899 = vmatprep.mubr.msk.f32.mxu1 %vm1983_vm1, %v1981_v0  ;;  %v1052_v44 = vsel %vm1050_vm7, %v1045_v42, %v1047_v40  ;;  %v1053_v48 = vsel %vm1050_vm7, %v1047_v40, %v1049_v43 }
  0xb0   : > { %952 = vmatprep.mubr.f32.mxu0 %v1981_v0  ;;  %1060 = vmatprep.subr.mxu0 %v1052_v44 }
  0xb1   : > { %1902 = vmatprep.subr.mxu1 %v1981_v0 }
  0xb2   : > { %v1043_v46 = vpop.permute.xlu0 %1042  ;;  %v1211_v47 = vpop.permute.xlu1 %1210 }
  0xb3   : > { %v1051_v49 = vsel %vm1050_vm7, %v1043_v46, %v1045_v42 }
  0xb5   : > { %1900 = vmatmul.mubr.msk.f32.vlgmr.msra.gmra.mrb[0].mxu1 %vm251_vm3, %v1842_v45 }
  0xb6   : > { %1843 = vmatmul.mubr.msk.f32.vlgmr.msra.gmra.mrb[0].mxu0 %vm251_vm3, %v1842_v45  ;;  %v1209_v50 = vpop.permute.xlu0 %1208  ;;  %1903 = vmatpush3.msra.mxu1 %v1053_v48  ;;  %v1213_v51 = vpop.permute.xlu1 %1212 }
  0xb7   : > { %1061 = vmatpush1.msra.mxu0 %v1051_v49  ;;  %1904 = vmatprep.mubr.msk.f32.mxu1 %vm1983_vm1, %v1981_v0  ;;  %v1216_v52 = vsel %vm1214_vm8, %v1209_v50, %v1211_v47  ;;  %v1217_v56 = vsel %vm1214_vm8, %v1211_v47, %v1213_v51 }
  0xb8   : > { %1124 = vmatprep.mubr.f32.mxu0 %v1981_v0  ;;  %1224 = vmatprep.subr.mxu0 %v1216_v52 }
  0xb9   : > { %1907 = vmatprep.subr.mxu1 %v1981_v0 }
  0xba   : > { %v1207_v54 = vpop.permute.xlu0 %1206  ;;  %v1375_v55 = vpop.permute.xlu1 %1374 }
  0xbb   : > { %v1215_v57 = vsel %vm1214_vm8, %v1207_v54, %v1209_v50 }
  0xbd   : > { %1905 = vmatmul.mubr.msk.f32.vlgmr.msra.gmra.mrb[0].mxu1 %vm251_vm3, %v1845_v53 }
  0xbe   : > { %1846 = vmatmul.mubr.msk.f32.vlgmr.msra.gmra.mrb[0].mxu0 %vm251_vm3, %v1845_v53  ;;  %v1373_v58 = vpop.permute.xlu0 %1372  ;;  %1908 = vmatpush3.msra.mxu1 %v1217_v56  ;;  %v1377_v59 = vpop.permute.xlu1 %1376 }
  0xbf   : > { %1225 = vmatpush1.msra.mxu0 %v1215_v57  ;;  %1909 = vmatprep.mubr.msk.f32.mxu1 %vm1983_vm1, %v1981_v0  ;;  %v1380_v60 = vsel %vm1378_vm9, %v1373_v58, %v1375_v55  ;;  %v1381_v3 = vsel %vm1378_vm9, %v1375_v55, %v1377_v59 }
  0xc0   : > { %1288 = vmatprep.mubr.f32.mxu0 %v1981_v0  ;;  %1388 = vmatprep.subr.mxu0 %v1380_v60 }
  0xc1   : > { %1912 = vmatprep.subr.mxu1 %v1981_v0 }
  0xc2   : > { %v1371_v62 = vpop.permute.xlu0 %1370  ;;  %v1539_v63 = vpop.permute.xlu1 %1538 }
  0xc3   : > { %v1379_v4 = vsel %vm1378_vm9, %v1371_v62, %v1373_v58 }
  0xc5   : > { %1910 = vmatmul.mubr.msk.f32.vlgmr.msra.gmra.mrb[0].mxu1 %vm251_vm3, %v1848_v61 }
  0xc6   : > { %1849 = vmatmul.mubr.msk.f32.vlgmr.msra.gmra.mrb[0].mxu0 %vm251_vm3, %v1848_v61  ;;  %v1537_v5 = vpop.permute.xlu0 %1536  ;;  %1913 = vmatpush3.msra.mxu1 %v1381_v3  ;;  %v1541_v7 = vpop.permute.xlu1 %1540 }
  0xc7   : > { %1389 = vmatpush1.msra.mxu0 %v1379_v4  ;;  %1914 = vmatprep.mubr.msk.f32.mxu1 %vm1983_vm1, %v1981_v0  ;;  %v1544_v6 = vsel %vm1542_vm10, %v1537_v5, %v1539_v63  ;;  %v1545_v10 = vsel %vm1542_vm10, %v1539_v63, %v1541_v7 }
  0xc8   : > { %1452 = vmatprep.mubr.f32.mxu0 %v1981_v0  ;;  %1552 = vmatprep.subr.mxu0 %v1544_v6 }
  0xc9   : > { %1917 = vmatprep.subr.mxu1 %v1981_v0 }
  0xca   : > { %v1535_v9 = vpop.permute.xlu0 %1534 }
  0xcb   : > { %v1543_v11 = vsel %vm1542_vm10, %v1535_v9, %v1537_v5 }
  0xcd   : > { %1915 = vmatmul.mubr.msk.f32.vlgmr.msra.gmra.mrb[0].mxu1 %vm251_vm3, %v1851_v8 }
  0xce   : > { %1852 = vmatmul.mubr.msk.f32.vlgmr.msra.gmra.mrb[0].mxu0 %vm251_vm3, %v1851_v8  ;;  %1918 = vmatpush3.msra.mxu1 %v1545_v10 }
  0xcf   : > { %1553 = vmatpush1.msra.mxu0 %v1543_v11  ;;  %1919 = vmatprep.mubr.msk.f32.mxu1 %vm1983_vm1, %v1981_v0 }
  0xd0   : > { %1616 = vmatprep.mubr.f32.mxu0 %v1981_v0 }
  0xd5   : > { %1920 = vmatmul.mubr.msk.f32.vlgmr.msra.gmra.mrb[0].mxu1 %vm251_vm3, %v1854_v12 }
  0xd6   : > { %1855 = vmatmul.mubr.msk.f32.vlgmr.msra.gmra.mrb[0].mxu0 %vm251_vm3, %v1854_v12 }
 0x1a8   : > { %v1689_v18 = vpop.f32.mrb[0].mxu1 }
 0x1a9   : > { %v1698_v20 = vmax.f32 %v1689_v18, 0.0  ;;  %v1618_v0 = vpop.f32.mrb[0].mxu0  ;;  %v1921_v21 = vpop.f32.mrb[1].mxu1 }
 0x1aa   : > { %v1696_v23 = vmax.f32 %v1618_v0, 0.0  ;;  %v1620_v1 = vpop.f32.mrb[1].mxu0 }
 0x1ab   : > { %v1717_v24 = vmul.f32 %v1711_v17, %v1698_v20  ;;  %v1697_v25 = vmax.f32 %v1620_v1, 0.0 }
 0x1ac   : > { %v1715_v26 = vmul.f32 %v1703_v19, %v1696_v23 }
 0x1ad   : > { %1720 = vst [vmem:[%s204_s28 + $0x10] sm:$0xff] %v1717_v24  ;;  %v1716_v27 = vmul.f32 %v1707_v22, %v1697_v25  ;;  %v1728_v2 = vmul.f32 %v1717_v24, %v1717_v24 }
 0x1ae   : > { %1718 = vst [vmem:[%s204_s28] sm:$0xff] %v1715_v26  ;;  %v1726_v28 = vmul.f32 %v1715_v26, %v1715_v26 }
 0x1af   : > { %1719 = vst [vmem:[%s204_s28 + $0x8] sm:$0xff] %v1716_v27  ;;  %v1721_v29 = vadd.f32 %v1716_v27, %v1715_v26  ;;  %v1727_v30 = vmul.f32 %v1716_v27, %v1716_v27 }
 0x1b1   : > { %v1722_v31 = vadd.f32 %v1721_v29, %v1717_v24  ;;  %v1729_v32 = vadd.f32 %v1727_v30, %v1726_v28 }
 0x1b3   : > { %1723 = vadd.xlane.f32.xlu0 %v1722_v31  ;;  %v1730_v33 = vadd.f32 %v1729_v32, %v1728_v2 }
 0x1b5   : > { %1731 = vadd.xlane.f32.xlu1 %v1730_v33 }
 0x240   : > { %v1724_v34 = vpop.xlane.xlu0 %1723 }
 0x241   : > { %1734 = vst.msk [vmem:[%s208_s5] sm:$0xff] %vm729_vm6, %v1724_v34 }
 0x242   : > { %v1732_v35 = vpop.xlane.xlu1 %1731 }
 0x243   : > { %1736 = vst.msk [vmem:[%s208_s5] sm:$0xff] %vm1735_vm11, %v1732_v35 }
 0x244 PF: > { %s15_s15 = sadd.s32 1, %s1979_s15  }
 0x245   : > { %p12_p4 = scmp.ge.s32.totalorder %s15_s15, 4  }
 0x247   :  { %14 = sbr.rel (!%p12_p4) target bundleno = 1 (0x1), region = 83 }

</bundles_post_ra>
